<compile_context>
chip_gen: v5e
topology: v5e:2x2
jax: 0.10.0
libtpu: 0.0.40
codegen_flags: <defaults>
</compile_context>

<pallas_src>
import jax
import jax.numpy as jnp
from jax.experimental import pallas as pl
from jax.experimental.pallas import tpu as pltpu


def _conv1x1_kernel(x_ref, w_ref, o_ref):
    # x_ref: (1, Cin, tm) tile of activations (spatial last -> lane-dense)
    # w_ref: (Cout, Cin) full weight, resident every grid step
    # o_ref: (1, Cout, tm) output tile (spatial last -> unmasked stores)
    o_ref[0] = jnp.dot(
        w_ref[...], x_ref[0], preferred_element_type=jnp.float32
    ).astype(o_ref.dtype)


def _round_up(a: int, b: int) -> int:
    return (a + b - 1) // b * b


def fixed_conv_1x1(x_nchw: jax.Array, weight_oi: jax.Array, *, tm_max: int = 2048):
    """1x1 conv, stride=1, padding=0, no bias (FixedConv.forward).

    x_nchw:    (N, Cin, H, W)
    weight_oi: (Cout, Cin)   -- PyTorch Conv2d weight viewed as (out, in)
    returns:   (N, Cout, H, W)
    """
    n, cin, h, w = x_nchw.shape
    cout = weight_oi.shape[0]
    hw = h * w

    # Pick the largest spatial tile (multiple of 128 lanes) that fits a
    # conservative VMEM budget with double-buffered input + output blocks.
    itemsize = jnp.dtype(x_nchw.dtype).itemsize
    per_col_bytes = 2 * (cin + cout) * itemsize  # 2x = double buffering
    vmem_budget = 8 * 1024 * 1024                # safe on v5e/v6e/v7x scoped VMEM
    tm_cap = max(128, (vmem_budget // per_col_bytes) // 128 * 128)
    tm = min(tm_max, tm_cap, _round_up(hw, 128))

    # Pad spatial length to a multiple of the tile (only when needed).
    hw_pad = _round_up(hw, tm)
    x3 = x_nchw.reshape(n, cin, hw)
    if hw_pad != hw:
        x3 = jnp.pad(x3, ((0, 0), (0, 0), (0, hw_pad - hw)))

    grid = (n, hw_pad // tm)

    out3 = pl.pallas_call(
        _conv1x1_kernel,
        out_shape=jax.ShapeDtypeStruct((n, cout, hw_pad), x_nchw.dtype),
        grid_spec=pl.GridSpec(
            grid=grid,
            in_specs=[
                pl.BlockSpec((1, cin, tm), lambda b, j: (b, 0, j)),
                pl.BlockSpec((cout, cin), lambda b, j: (0, 0)),
            ],
            out_specs=pl.BlockSpec((1, cout, tm), lambda b, j: (b, 0, j)),
        ),
        compiler_params=pltpu.CompilerParams(
            dimension_semantics=("parallel", "parallel"),
        ),
    )(x3, weight_oi)

    if hw_pad != hw:
        out3 = out3[:, :, :hw]
    return out3.reshape(n, cout, h, w)


def make_fixed_conv_weight(in_channels: int, out_channels: int, key) -> jax.Array:
    """Deterministic weight init matching FixedConv.__init__ for kernel_size=1."""
    if in_channels == out_channels:
        # nn.init.eye_ on the (out, in) view
        return jnp.eye(out_channels, in_channels, dtype=jnp.float32)
    # nn.init.xavier_uniform_ equivalent (gain=1) for a (Cout, Cin, 1, 1) kernel
    fan_in, fan_out = in_channels, out_channels
    bound = (6.0 / (fan_in + fan_out)) ** 0.5
    return jax.random.uniform(
        key, (out_channels, in_channels), jnp.float32, -bound, bound
    )


if __name__ == "__main__":
    key = jax.random.PRNGKey(0)
    kx, kw = jax.random.split(key)

    # Small shapes consistent with the module: batch=2, channels=4, spatial=16.
    N, C, H, W = 2, 4, 16, 16
    x = jax.random.normal(kx, (N, C, H, W), dtype=jnp.float32)

    # Default FixedConv(in=out, kernel_size=1) -> identity weight.
    weight = make_fixed_conv_weight(C, C, kw)

    y = fixed_conv_1x1(x, weight)
    y = jax.block_until_ready(y)

    # Reference check: 1x1 conv == channel-mixing matmul (identity here).
    ref = jnp.einsum("nchw,oc->nohw", x, weight)
    assert y.shape == (N, C, H, W)
    assert jnp.allclose(y, ref, atol=1e-5), "mismatch vs. reference conv"

    print("KERNEL_OK")
</pallas_src>

<mosaic_0001>
module attributes {stable_mosaic.version = 11 : i64} {
  func.func @_conv1x1_kernel(%arg0: i32, %arg1: i32, %arg2: memref<1x4x256xf32, #tpu.memory_space<vmem>>, %arg3: memref<4x4xf32, #tpu.memory_space<vmem>>, %arg4: memref<1x4x256xf32, #tpu.memory_space<vmem>>) attributes {dimension_semantics = [#tpu.dimension_semantics<parallel>, #tpu.dimension_semantics<parallel>], iteration_bounds = array<i64: 2, 1>, scalar_prefetch = 0 : i64, scratch_operands = 0 : i64, tpu.core_type = #tpu.core_type<tc>, window_params = [{transform_indices = @transform_0, window_bounds = array<i64: 1, 4, 256>}, {pipeline_mode = #tpu.pipeline_mode<synchronous>, transform_indices = @transform_1, window_bounds = array<i64: 4, 4>}, {transform_indices = @transform_2, window_bounds = array<i64: 1, 4, 256>}]} {
    %c0 = arith.constant 0 : index
    %c0_0 = arith.constant 0 : index
    %0 = vector.load %arg3[%c0, %c0_0] : memref<4x4xf32, #tpu.memory_space<vmem>>, vector<4x4xf32>
    %c0_1 = arith.constant 0 : index
    %c0_2 = arith.constant 0 : index
    %c0_3 = arith.constant 0 : index
    %1 = vector.load %arg2[%c0_1, %c0_2, %c0_3] : memref<1x4x256xf32, #tpu.memory_space<vmem>>, vector<1x4x256xf32>
    %2 = vector.shape_cast %1 : vector<1x4x256xf32> to vector<4x256xf32>
    %cst = arith.constant dense<0.000000e+00> : vector<4x256xf32>
    %3 = tpu.matmul %0, %2, %cst {dimension_numbers = #tpu.dot_dimension_numbers<[1], [0], [0], [1], [0, 0, 1, 1], [], []>} : vector<4x4xf32>, vector<4x256xf32>, vector<4x256xf32> -> vector<4x256xf32>
    %c0_4 = arith.constant 0 : index
    %c0_5 = arith.constant 0 : index
    %c0_6 = arith.constant 0 : index
    %4 = vector.load %arg4[%c0_4, %c0_5, %c0_6] : memref<1x4x256xf32, #tpu.memory_space<vmem>>, vector<1x4x256xf32>
    %5 = vector.shape_cast %4 : vector<1x4x256xf32> to vector<4x256xf32>
    %6 = vector.shape_cast %3 : vector<4x256xf32> to vector<1x4x256xf32>
    tpu.vector_store %arg4[%c0_4, %c0_5, %c0_6], %6 {strides = array<i32>} : memref<1x4x256xf32, #tpu.memory_space<vmem>>, vector<1x4x256xf32>,
    return
  }
  func.func @transform_0(%arg0: i32, %arg1: i32) -> (i32, i32, i32) {
    %c0_i32 = arith.constant 0 : i32
    %c0_i32_0 = arith.constant 0 : i32
    return %arg0, %c0_i32, %arg1 : i32, i32, i32
  }
  func.func @transform_1(%arg0: i32, %arg1: i32) -> (i32, i32) {
    %c0_i32 = arith.constant 0 : i32
    %c0_i32_0 = arith.constant 0 : i32
    %c0_i32_1 = arith.constant 0 : i32
    return %c0_i32, %c0_i32_0 : i32, i32
  }
  func.func @transform_2(%arg0: i32, %arg1: i32) -> (i32, i32, i32) {
    %c0_i32 = arith.constant 0 : i32
    %c0_i32_0 = arith.constant 0 : i32
    return %arg0, %c0_i32, %arg1 : i32, i32, i32
  }
}

</mosaic_0001>

<bundles_post_ra>
// kernel: tpu_custom_call.1
= control target key start
LH: loop header
LB: loop body
LE: loop exit
PB: predicated region body
PF: predicated region fallthrough
CT: control target
= control target key end

     0   :  { %7 = vsyncpa [#allocation3], 0  ;;  %s783_s0 = inlined_call_operand.hbm [shape: f32[2,4,256], index: 0, kind: input, shape index: {}]   ;;  %s784_s1 = inlined_call_operand.hbm [shape: f32[4,4], index: 1, kind: input, shape index: {}]   ;;  %s785_s2 = inlined_call_operand.hbm [shape: f32[2,4,256], index: 2, kind: output, shape index: {}]  }
   0x1   :  { %9 = vsyncpa [#allocation3 + $0x1], 0 }
   0x2   :  { %10 = vsyncpa [#allocation6], 0 }
   0x3   :  { %11 = vsyncpa [#allocation4], 0 }
   0x4   :  { %13 = vsyncpa [#allocation4 + $0x1], 0  ;;  %s631_s9 = smov 0   ;;  %s633_s10 = smov 0  }
   0x5   :  { %s635_s11 = smov 0   ;;  %s637_s12 = smov 0  }
   0x6   :  { %s639_s13 = smov 0   ;;  %s641_s14 = smov 0  }
   0x7 LB: > { %s371_s15 = sadd.s32 4294967295, %s613_s14   ;;  %s372_s16 = sadd.s32 4294967294, %s613_s14   ;;  %s613_s14 = sphi %s641_s14, %s19_s14   ;;  %s609_s13 = sphi %s639_s13, %s797_s13   ;;  %s605_s12 = sphi %s637_s12, %s796_s12   ;;  %s601_s11 = sphi %s635_s11, %s795_s11   ;;  %s597_s10 = sphi %s633_s10, %s794_s10   ;;  %s593_s9 = sphi %s631_s9, %s793_s9  }
   0x8   : > { %p53_p0 = scmp.ne.s32.totalorder %s597_s10, %s593_s9  ;;  %p665_p1 = scmp.eq.s32.totalorder %s371_s15, 0 }
   0x9   : > { %p669_p2 = scmp.eq.s32.totalorder %s371_s15, 1  ;;  %p106_p3 = scmp.eq.s32.totalorder %s372_s16, 1 }
   0xa   : > { %p675_p4 = por %p665_p1, %p53_p0  ;;  %p373_p5 = scmp.ge.s32.totalorder %s613_s14, 1 }
   0xb   : > { %p680_p6 = por %p106_p3, %p53_p0  ;;  %p113_p7 = scmp.lt.s32.totalorder %s613_s14, 3 }
   0xc   : > { %s125_s23 = sshll.u32 %s784_s1, 4  ;;  %p375_p9 = scmp.ge.s32.totalorder %s613_s14, 2  ;;  %s126_s23 = int_to_ptr.hbm [resolvable:$true] %s125_s23 }
   0xd   : > { %p688_p8 = pnand %p373_p5, %p113_p7  ;;  %s615_s25 = smov [#allocation5]  }
   0xe   : > { %s127_s26 = sshll.u32 %s615_s25, 4  ;;  %s31_s27 = sadd.s32 1, %s609_s13  ;;  %s128_s26 = int_to_ptr.vmem [resolvable:$true] %s127_s26 }
   0xf   : > { %p402_p10 = pneg %p688_p8  ;;  %p33_p12 = scmp.ge.s32.totalorder %s31_s27, 2 }
  0x10   : > { %s40_s28 = sadd.s32 1, %s601_s11  ;;  %p47_p13 = scmp.ne.s32.totalorder %s601_s11, %s597_s10 }
  0x11   : > { %p403_p11 = pnand %p402_p10, %p665_p1  ;;  %p48_p0 = scmp.eq.s32.totalorder %s613_s14, 0 }
  0x12   : > { %s799_s27 = smov (%p33_p12, %s31_s27), 0  ;;  %p710_p5 = por %p669_p2, %p47_p13 }
  0x13   : > { %405 = dma.hbm_to_vmem [thread:$0]  (!%p403_p11), %s126_s23, 64, %s128_s26, [#allocation6]  }
  0x14   : > { %p704_p3 = por %p48_p0, %p47_p13  ;;  %s35_s3 = ssub.s32 %s609_s13, %s799_s27 }
  0x15   : > { %p415_p7 = scmp.lt.s32.totalorder %s613_s14, 2  ;;  %p38_p10 = scmp.eq.s32.totalorder %s35_s3, 0 }
  0x16   : > { %s138_s4 = sand.u32 1, %s601_s11   ;;  %s392_s7 = sshll.u32 %s609_s13, 3 }
  0x17   : > { %s376_s5 = sshll.u32 %s138_s4, 3  ;;  %s149_s16 = scalar_lea.hbm %s783_s0, %s392_s7 }
  0x18   : > { %s719_s6 = scalar_select %p38_p10, %s601_s11, %s40_s28  }
  0x19   : > { %s142_s21 = scalar_lea.vmem [#allocation2], %s376_s5  ;;  %s151_s18 = sshll.u32 %s149_s16, 4  ;;  %s152_s18 = int_to_ptr.hbm [resolvable:$true] %s151_s18 }
  0x1a   : > { %s153_s22 = sshll.u32 %s142_s21, 4  ;;  %p407_p2 = pnand %p415_p7, %p704_p3  ;;  %s154_s22 = int_to_ptr.vmem [resolvable:$true] %s153_s22 }
  0x1b   : > { %s139_s23 = scalar_lea.sflag [#allocation3], %s138_s4  ;;  %162 = sbr.rel (%p688_p8) target bundleno = 177 (0xb1), region = 28 }
  0x1c   : > { %409 = dma.hbm_to_vmem [thread:$0]  (!%p407_p2), %s152_s18, 128, %s154_s22, %s139_s23  }
  0x1d   : > { %s730_s25 = sand.u32 (!%p688_p8), 1, %s597_s10  }
  0x1e   : > { %s380_s26 = sshll.u32 (!%p688_p8), %s730_s25, 3  ;;  %s165_s28 = scalar_lea.sflag (!%p688_p8), [#allocation3], %s730_s25 }
  0x1f   : > { %s168_s3 = scalar_lea.vmem (!%p688_p8), [#allocation2], %s380_s26 }
  0x20   : > { %580 = dma.done.wait (%p675_p4), %s165_s28, 128  }
  0x21   : > { %582 = vsyncadd (%p675_p4), %s165_s28, 4294967168 }
  0x22   : > { %584 = dma.done.wait (%p665_p1), [#allocation6], 64  }
  0x23   : > { %586 = vsyncadd (%p665_p1), [#allocation6], 4294967232  ;;  %v198_v0 = vld [vmem:[%s168_s3] sm:$0xff]  ;;  %vm207_vm0 = vcmask 1043456   ;;  %v197_v1 = vld [vmem:[#allocation5] sm:$0xf] }
  0x24   : > { %200 = vst [vmem:[#allocation1] ss:$2 sm:$0xff] %v198_v0  ;;  %vm203_vm1 = vcmask 31744   ;;  %s393_s19 = sshll.u32 %s605_s12, 3  ;;  %s194_s4 = scalar_lea.vmem [#allocation7], %s380_s26 }
  0x25   : > { %s272_s17 = scalar_lea.hbm %s785_s2, %s393_s19  ;;  %s274_s5 = sshll.u32 %s194_s4, 4  ;;  %s275_s5 = int_to_ptr.vmem [resolvable:$true] %s274_s5 }
  0x26   : > { %s276_s7 = sshll.u32 %s272_s17, 4  ;;  %s259_s8 = scalar_lea.sflag [#allocation4], %s730_s25  ;;  %s277_s7 = int_to_ptr.hbm [resolvable:$true] %s276_s7 }
  0x27   : > { %s541_s15 = sshra.s32 %s277_s7, 4  ;;  %s547_s22 = scalar_lea.hbm %s785_s2, 16  ;;  %s542_s15 = int_to_ptr.hbm [resolvable:$true] %s541_s15 }
  0x28   : > { %s543_s12 = scalar_lea.hbm %s542_s15, 8  ;;  %p548_p11 = scmp.lt.s32.totalorder %s542_s15, %s785_s2 }
  0x29   : > { %p544_p1 = scmp.ne.s32.totalorder %s542_s15, %s543_s12  ;;  %p549_p12 = scmp.lt.s32.totalorder %s547_s22, %s543_s12 }
  0x2b   : > { %v202_v2 = vld.sshfl [vmem:[#allocation1 + $0x8] sm:$0xff pattern:$0x75316420]  ;;  %v201_v3 = vld.sshfl [vmem:[#allocation1] sm:$0xff pattern:$0x75316420]  ;;  %p545_p4 = pnand %p544_p1, %p710_p5  ;;  %p550_p13 = por %p549_p12, %p548_p11 }
  0x2c   : > { %385 = vmatpush.msk.msra.mxu1 %vm207_vm0, %v202_v2  ;;  %383 = vmatpush.msk.msra.mxu0 %vm207_vm0, %v201_v3 }
  0x2d   : > { %386 = vmatmul.msk.f32.vlgmr.msra.gmra.mxu1 %vm203_vm1, %v197_v1  ;;  %384 = vmatmul.msk.f32.vlgmr.msra.gmra.mxu0 %vm203_vm1, %v197_v1  ;;  %p546_p8 = pneg %p545_p4 }
  0x2f   : > { %p551_p0 = pnand %p550_p13, %p546_p8 }
  0xaa   : > { %v249_v4 = vpop.f32.mrf.mxu1  ;;  %v229_v5 = vpop.f32.mrf.mxu0 }
  0xab   : > { %v254_v6 = vrot.slane %v249_v4, 4 }
  0xad   : > { %v255_v7 = vsel %vm207_vm0, %v229_v5, %v254_v6 }
  0xae   : > { %257 = vst [vmem:[%s194_s4] sm:$0xff] %v255_v7 }
  0xaf   : > { %554 = shalt.err (!%p551_p0)
}
  0xb0   : > { %400 = dma.vmem_to_hbm [thread:$0]  (%p710_p5), %s275_s5, 128, %s277_s7, %s259_s8  }
  0xb1 PF: > { %s288_s25 = sand.u32 1, %s593_s9   ;;  %p411_p3 = pnand %p375_p9, %p680_p6 }
  0xb2   : > { %s289_s26 = scalar_lea.sflag [#allocation4], %s288_s25 }
  0xb3   : > { %p412_p7 = pneg %p411_p3 }
  0xb5   : > { %588 = dma.done.wait (%p412_p7), %s289_s26, 128  }
  0xb6   : > { %590 = vsyncadd (%p412_p7), %s289_s26, 4294967168  ;;  %s19_s14 = sadd.s32 1, %s613_s14   ;;  %s793_s9 = smov %s597_s10 }
  0xb7   : > { %p16_p10 = scmp.ge.s32.totalorder %s19_s14, 4   ;;  %s794_s10 = smov %s601_s11 }
  0xb8   : > { %s795_s11 = smov %s719_s6  ;;  %s796_s12 = smov %s609_s13 }
  0xb9   : > { %s797_s13 = smov %s799_s27  ;;  %18 = sbr.rel (!%p16_p10) target bundleno = 7 (0x7), region = 77 }
  0xbe   :  { %295 = vsyncpa [#allocation3], 1 }
  0xbf   :  { %297 = vsyncpa [#allocation3 + $0x1], 1 }
  0xc0   :  { %298 = vsyncpa [#allocation6], 1 }
  0xc1   :  { %299 = vsyncpa [#allocation4], 1 }
  0xc2   :  { %301 = vsyncpa [#allocation4 + $0x1], 1 }

</bundles_post_ra>
